<compile_context>
chip_gen: v7x
topology: tpu7x:2x2x1
jax: 0.10.0
libtpu: 0.0.40
codegen_flags: <defaults>
</compile_context>

<pallas_src>
import jax
import jax.numpy as jnp
from jax.experimental import pallas as pl
from jax.experimental.pallas import tpu as pltpu


D_IN = 784
D_H = 256
D_Z = 8        # self.num_hidden in the PyTorch module
D_ZP = 128     # zero-padded bottleneck width (lane-dense on TPU)


def autoencoder_kernel(x_ref,
                       w1_ref, b1_ref,
                       w2_ref, b2_ref,
                       w3_ref, b3_ref,
                       w4_ref, b4_ref,
                       enc_ref, dec_ref):
    # x arrives f32 from HBM; cast to bf16 only for the MXU operands.
    x = x_ref[...].astype(jnp.bfloat16)

    # encoder: Linear(784,256) -> ReLU -> Linear(256,8 [padded to 128]) -> ReLU
    h1 = jnp.dot(x, w1_ref[...], preferred_element_type=jnp.float32) + b1_ref[...]
    h1 = jnp.maximum(h1, 0.0).astype(jnp.bfloat16)
    enc = jnp.dot(h1, w2_ref[...], preferred_element_type=jnp.float32) + b2_ref[...]
    enc = jnp.maximum(enc, 0.0)                 # padded lanes [D_Z:] are exactly 0
    enc_bf = enc.astype(jnp.bfloat16)

    # decoder: Linear(8 [128],256) -> ReLU -> Linear(256,784) -> Sigmoid
    h2 = jnp.dot(enc_bf, w3_ref[...], preferred_element_type=jnp.float32) + b3_ref[...]
    h2 = jnp.maximum(h2, 0.0).astype(jnp.bfloat16)
    logits = jnp.dot(h2, w4_ref[...], preferred_element_type=jnp.float32) + b4_ref[...]
    dec = jax.nn.sigmoid(logits)                # exp/recip live on the (idle) EUP slot

    enc_ref[...] = enc[:, :D_Z].astype(enc_ref.dtype)   # un-padded [block_b, 8] store
    dec_ref[...] = dec.astype(dec_ref.dtype)


def _round_up(n, m):
    return ((n + m - 1) // m) * m


def _choose_block_b(B):
    """Batch tile: small B -> single block; large B -> >=2 (ideally 4) grid
    steps so v7x's two TensorCores both get work, capped at 1024 rows so
    double-buffered tiles + f32 intermediates fit v7x's 64 MiB VMEM."""
    if B <= 256:
        return B
    return int(min(1024, max(128, _round_up(pl.cdiv(B, 4), 128))))


def prepare_params(params):
    """One-time (per-parameter-update) conversion into the kernel's layout:
    bf16 weights, and the 8-wide bottleneck zero-padded to 128 lanes.  The
    padded columns/rows are exactly zero through ReLU, so the real 8 lanes
    are unchanged and the small matmuls become lane-dense."""
    w2 = jnp.zeros((D_H, D_ZP), jnp.float32).at[:, :D_Z].set(params["w2"])
    b2 = jnp.zeros((1, D_ZP), jnp.float32).at[:, :D_Z].set(params["b2"])
    w3 = jnp.zeros((D_ZP, D_H), jnp.float32).at[:D_Z, :].set(params["w3"])
    return dict(
        w1=params["w1"].astype(jnp.bfloat16),
        b1=params["b1"].astype(jnp.float32).reshape(1, D_H),
        w2=w2.astype(jnp.bfloat16),
        b2=b2,
        w3=w3.astype(jnp.bfloat16),
        b3=params["b3"].astype(jnp.float32).reshape(1, D_H),
        w4=params["w4"].astype(jnp.bfloat16),
        b4=params["b4"].astype(jnp.float32).reshape(1, D_IN),
    )


def autoencoder_forward(x, prepared, *, block_b=None, out_dtype=jnp.bfloat16):
    """x: [B, 784] float32; prepared: output of prepare_params().
    Returns (encoded [B,8], decoded [B,784]) in out_dtype."""
    B, Din = x.shape
    assert Din == D_IN
    x = x.astype(jnp.float32)

    if block_b is None:
        block_b = _choose_block_b(B)
    grid = (pl.cdiv(B, block_b),)   # edge block (if any) is masked by Pallas

    w1, b1 = prepared["w1"], prepared["b1"]
    w2, b2 = prepared["w2"], prepared["b2"]
    w3, b3 = prepared["w3"], prepared["b3"]
    w4, b4 = prepared["w4"], prepared["b4"]

    # Weights/biases never change across the grid -> keep a single resident
    # VMEM copy (no double buffering) to preserve VMEM headroom.
    def _resident(arr):
        return pl.BlockSpec(arr.shape, lambda i: (0, 0),
                            pipeline_mode=pl.Buffered(1))

    out_bytes = jnp.dtype(out_dtype).itemsize
    flops = 2 * B * (D_IN * D_H + D_H * D_ZP + D_ZP * D_H + D_H * D_IN)
    bytes_accessed = (
        B * D_IN * 4                              # x (f32 in)
        + B * D_IN * out_bytes                    # decoded out
        + B * D_Z * out_bytes                     # encoded out
        + (w1.size + w2.size + w3.size + w4.size) * 2   # bf16 weights
        + (b1.size + b2.size + b3.size + b4.size) * 4)  # f32 biases
    cost = pl.CostEstimate(flops=flops,
                           transcendentals=B * D_IN,     # sigmoid exp
                           bytes_accessed=bytes_accessed)

    enc, dec = pl.pallas_call(
        autoencoder_kernel,
        grid=grid,
        in_specs=[
            pl.BlockSpec((block_b, D_IN), lambda i: (i, 0)),   # x tile (f32)
            _resident(w1), _resident(b1),
            _resident(w2), _resident(b2),
            _resident(w3), _resident(b3),
            _resident(w4), _resident(b4),
        ],
        out_specs=(
            pl.BlockSpec((block_b, D_Z), lambda i: (i, 0)),    # encoded [B, 8]
            pl.BlockSpec((block_b, D_IN), lambda i: (i, 0)),   # decoded [B, 784]
        ),
        out_shape=(
            jax.ShapeDtypeStruct((B, D_Z), out_dtype),
            jax.ShapeDtypeStruct((B, D_IN), out_dtype),
        ),
        compiler_params=pltpu.CompilerParams(
            dimension_semantics=("parallel",),
            vmem_limit_bytes=40 * 1024 * 1024,
        ),
        cost_estimate=cost,
    )(x, w1, b1, w2, b2, w3, b3, w4, b4)

    return enc, dec


def init_params(key):
    """Deterministic init mimicking nn.Linear's U(-1/sqrt(fan_in), 1/sqrt(fan_in))."""
    def linear(key, fan_in, fan_out):
        kw, kb = jax.random.split(key)
        bound = 1.0 / jnp.sqrt(fan_in)
        w = jax.random.uniform(kw, (fan_in, fan_out), jnp.float32, -bound, bound)
        b = jax.random.uniform(kb, (1, fan_out), jnp.float32, -bound, bound)
        return w, b

    k1, k2, k3, k4 = jax.random.split(key, 4)
    w1, b1 = linear(k1, D_IN, D_H)
    w2, b2 = linear(k2, D_H, D_Z)
    w3, b3 = linear(k3, D_Z, D_H)
    w4, b4 = linear(k4, D_H, D_IN)
    return dict(w1=w1, b1=b1, w2=w2, b2=b2, w3=w3, b3=b3, w4=w4, b4=b4)


def reference_forward(x, p):
    h1 = jnp.maximum(x @ p["w1"] + p["b1"], 0.0)
    enc = jnp.maximum(h1 @ p["w2"] + p["b2"], 0.0)
    h2 = jnp.maximum(enc @ p["w3"] + p["b3"], 0.0)
    dec = jax.nn.sigmoid(h2 @ p["w4"] + p["b4"])
    return enc, dec


if __name__ == "__main__":
    key = jax.random.PRNGKey(0)
    k_params, k_x = jax.random.split(key)

    params = init_params(k_params)
    prepared = prepare_params(params)          # one-time weight prep (bf16 + padding)

    B = 8
    x = jax.random.uniform(k_x, (B, D_IN), jnp.float32)   # pixel-like inputs in [0,1)

    enc, dec = autoencoder_forward(x, prepared)
    enc, dec = jax.block_until_ready((enc, dec))

    # sanity-check against pure-JAX f32 reference (bf16 MXU path + bf16 outputs
    # -> relaxed tolerance)
    enc_ref, dec_ref = reference_forward(x, params)
    assert enc.shape == (B, D_Z) and dec.shape == (B, D_IN)
    assert jnp.allclose(enc.astype(jnp.float32), enc_ref, atol=3e-2, rtol=3e-2)
    assert jnp.allclose(dec.astype(jnp.float32), dec_ref, atol=3e-2, rtol=3e-2)

    print("KERNEL_OK")
</pallas_src>

<mosaic_0001>
module attributes {stable_mosaic.version = 11 : i64} {
  func.func @autoencoder_kernel(%arg0: i32, %arg1: memref<8x784xf32, #tpu.memory_space<vmem>>, %arg2: memref<784x256xbf16, #tpu.memory_space<vmem>>, %arg3: memref<1x256xf32, #tpu.memory_space<vmem>>, %arg4: memref<256x128xbf16, #tpu.memory_space<vmem>>, %arg5: memref<1x128xf32, #tpu.memory_space<vmem>>, %arg6: memref<128x256xbf16, #tpu.memory_space<vmem>>, %arg7: memref<1x256xf32, #tpu.memory_space<vmem>>, %arg8: memref<256x784xbf16, #tpu.memory_space<vmem>>, %arg9: memref<1x784xf32, #tpu.memory_space<vmem>>, %arg10: memref<8x8xbf16, #tpu.memory_space<vmem>>, %arg11: memref<8x784xbf16, #tpu.memory_space<vmem>>) attributes {dimension_semantics = [#tpu.dimension_semantics<parallel>], iteration_bounds = array<i64: 1>, scalar_prefetch = 0 : i64, scratch_operands = 0 : i64, tpu.core_type = #tpu.core_type<tc>, window_params = [{transform_indices = @transform_0, window_bounds = array<i64: 8, 784>}, {pipeline_mode = #tpu.pipeline_mode<synchronous>, transform_indices = @transform_1, window_bounds = array<i64: 784, 256>}, {pipeline_mode = #tpu.pipeline_mode<synchronous>, transform_indices = @transform_2, window_bounds = array<i64: 1, 256>}, {pipeline_mode = #tpu.pipeline_mode<synchronous>, transform_indices = @transform_3, window_bounds = array<i64: 256, 128>}, {pipeline_mode = #tpu.pipeline_mode<synchronous>, transform_indices = @transform_4, window_bounds = array<i64: 1, 128>}, {pipeline_mode = #tpu.pipeline_mode<synchronous>, transform_indices = @transform_5, window_bounds = array<i64: 128, 256>}, {pipeline_mode = #tpu.pipeline_mode<synchronous>, transform_indices = @transform_6, window_bounds = array<i64: 1, 256>}, {pipeline_mode = #tpu.pipeline_mode<synchronous>, transform_indices = @transform_7, window_bounds = array<i64: 256, 784>}, {pipeline_mode = #tpu.pipeline_mode<synchronous>, transform_indices = @transform_8, window_bounds = array<i64: 1, 784>}, {transform_indices = @transform_9, window_bounds = array<i64: 8, 8>}, {transform_indices = @transform_10, window_bounds = array<i64: 8, 784>}]} {
    %c0 = arith.constant 0 : index
    %c0_0 = arith.constant 0 : index
    %0 = vector.load %arg1[%c0, %c0_0] : memref<8x784xf32, #tpu.memory_space<vmem>>, vector<8x784xf32>
    %1 = arith.truncf %0 : vector<8x784xf32> to vector<8x784xbf16>
    %c0_1 = arith.constant 0 : index
    %c0_2 = arith.constant 0 : index
    %2 = vector.load %arg2[%c0_1, %c0_2] : memref<784x256xbf16, #tpu.memory_space<vmem>>, vector<784x256xbf16>
    %cst = arith.constant dense<0.000000e+00> : vector<8x256xf32>
    %3 = tpu.matmul %1, %2, %cst {dimension_numbers = #tpu.dot_dimension_numbers<[1], [0], [0], [1], [0, 0, 1, 1], [], []>} : vector<8x784xbf16>, vector<784x256xbf16>, vector<8x256xf32> -> vector<8x256xf32>
    %c0_3 = arith.constant 0 : index
    %c0_4 = arith.constant 0 : index
    %4 = vector.load %arg3[%c0_3, %c0_4] : memref<1x256xf32, #tpu.memory_space<vmem>>, vector<1x256xf32>
    %5 = vector.broadcast %4 : vector<1x256xf32> to vector<8x256xf32>
    %6 = arith.addf %3, %5 : vector<8x256xf32>
    %cst_5 = arith.constant 0.000000e+00 : f32
    %7 = vector.broadcast %cst_5 : f32 to vector<8x256xf32>
    %8 = arith.maximumf %6, %7 : vector<8x256xf32>
    %9 = arith.truncf %8 : vector<8x256xf32> to vector<8x256xbf16>
    %c0_6 = arith.constant 0 : index
    %c0_7 = arith.constant 0 : index
    %10 = vector.load %arg4[%c0_6, %c0_7] : memref<256x128xbf16, #tpu.memory_space<vmem>>, vector<256x128xbf16>
    %cst_8 = arith.constant dense<0.000000e+00> : vector<8x128xf32>
    %11 = tpu.matmul %9, %10, %cst_8 {dimension_numbers = #tpu.dot_dimension_numbers<[1], [0], [0], [1], [0, 0, 1, 1], [], []>} : vector<8x256xbf16>, vector<256x128xbf16>, vector<8x128xf32> -> vector<8x128xf32>
    %c0_9 = arith.constant 0 : index
    %c0_10 = arith.constant 0 : index
    %12 = vector.load %arg5[%c0_9, %c0_10] : memref<1x128xf32, #tpu.memory_space<vmem>>, vector<1x128xf32>
    %13 = vector.broadcast %12 : vector<1x128xf32> to vector<8x128xf32>
    %14 = arith.addf %11, %13 : vector<8x128xf32>
    %cst_11 = arith.constant 0.000000e+00 : f32
    %15 = vector.broadcast %cst_11 : f32 to vector<8x128xf32>
    %16 = arith.maximumf %14, %15 : vector<8x128xf32>
    %17 = arith.truncf %16 : vector<8x128xf32> to vector<8x128xbf16>
    %c0_12 = arith.constant 0 : index
    %c0_13 = arith.constant 0 : index
    %18 = vector.load %arg6[%c0_12, %c0_13] : memref<128x256xbf16, #tpu.memory_space<vmem>>, vector<128x256xbf16>
    %cst_14 = arith.constant dense<0.000000e+00> : vector<8x256xf32>
    %19 = tpu.matmul %17, %18, %cst_14 {dimension_numbers = #tpu.dot_dimension_numbers<[1], [0], [0], [1], [0, 0, 1, 1], [], []>} : vector<8x128xbf16>, vector<128x256xbf16>, vector<8x256xf32> -> vector<8x256xf32>
    %c0_15 = arith.constant 0 : index
    %c0_16 = arith.constant 0 : index
    %20 = vector.load %arg7[%c0_15, %c0_16] : memref<1x256xf32, #tpu.memory_space<vmem>>, vector<1x256xf32>
    %21 = vector.broadcast %20 : vector<1x256xf32> to vector<8x256xf32>
    %22 = arith.addf %19, %21 : vector<8x256xf32>
    %cst_17 = arith.constant 0.000000e+00 : f32
    %23 = vector.broadcast %cst_17 : f32 to vector<8x256xf32>
    %24 = arith.maximumf %22, %23 : vector<8x256xf32>
    %25 = arith.truncf %24 : vector<8x256xf32> to vector<8x256xbf16>
    %c0_18 = arith.constant 0 : index
    %c0_19 = arith.constant 0 : index
    %26 = vector.load %arg8[%c0_18, %c0_19] : memref<256x784xbf16, #tpu.memory_space<vmem>>, vector<256x784xbf16>
    %cst_20 = arith.constant dense<0.000000e+00> : vector<8x784xf32>
    %27 = tpu.matmul %25, %26, %cst_20 {dimension_numbers = #tpu.dot_dimension_numbers<[1], [0], [0], [1], [0, 0, 1, 1], [], []>} : vector<8x256xbf16>, vector<256x784xbf16>, vector<8x784xf32> -> vector<8x784xf32>
    %c0_21 = arith.constant 0 : index
    %c0_22 = arith.constant 0 : index
    %28 = vector.load %arg9[%c0_21, %c0_22] : memref<1x784xf32, #tpu.memory_space<vmem>>, vector<1x784xf32>
    %29 = vector.broadcast %28 : vector<1x784xf32> to vector<8x784xf32>
    %30 = arith.addf %27, %29 : vector<8x784xf32>
    %31 = arith.negf %30 : vector<8x784xf32>
    %32 = math.exp %31 : vector<8x784xf32>
    %cst_23 = arith.constant 1.000000e+00 : f32
    %33 = vector.broadcast %cst_23 : f32 to vector<8x784xf32>
    %34 = arith.addf %33, %32 : vector<8x784xf32>
    %35 = arith.divf %33, %34 : vector<8x784xf32>
    %36 = vector.extract_strided_slice %16 {offsets = [0, 0], sizes = [8, 8], strides = [1, 1]} : vector<8x128xf32> to vector<8x8xf32>
    %37 = arith.truncf %36 : vector<8x8xf32> to vector<8x8xbf16>
    %c0_24 = arith.constant 0 : index
    %c0_25 = arith.constant 0 : index
    %38 = vector.load %arg10[%c0_24, %c0_25] : memref<8x8xbf16, #tpu.memory_space<vmem>>, vector<8x8xbf16>
    tpu.vector_store %arg10[%c0_24, %c0_25], %37 {strides = array<i32>} : memref<8x8xbf16, #tpu.memory_space<vmem>>, vector<8x8xbf16>,
    %39 = arith.truncf %35 : vector<8x784xf32> to vector<8x784xbf16>
    %c0_26 = arith.constant 0 : index
    %c0_27 = arith.constant 0 : index
    %40 = vector.load %arg11[%c0_26, %c0_27] : memref<8x784xbf16, #tpu.memory_space<vmem>>, vector<8x784xbf16>
    tpu.vector_store %arg11[%c0_26, %c0_27], %39 {strides = array<i32>} : memref<8x784xbf16, #tpu.memory_space<vmem>>, vector<8x784xbf16>,
    return
  }
  func.func @transform_0(%arg0: i32) -> (i32, i32) {
    %c0_i32 = arith.constant 0 : i32
    %c0_i32_0 = arith.constant 0 : i32
    return %arg0, %c0_i32 : i32, i32
  }
  func.func @transform_1(%arg0: i32) -> (i32, i32) {
    %c0_i32 = arith.constant 0 : i32
    %c0_i32_0 = arith.constant 0 : i32
    %c0_i32_1 = arith.constant 0 : i32
    return %c0_i32, %c0_i32_0 : i32, i32
  }
  func.func @transform_2(%arg0: i32) -> (i32, i32) {
    %c0_i32 = arith.constant 0 : i32
    %c0_i32_0 = arith.constant 0 : i32
    %c0_i32_1 = arith.constant 0 : i32
    return %c0_i32, %c0_i32_0 : i32, i32
  }
  func.func @transform_3(%arg0: i32) -> (i32, i32) {
    %c0_i32 = arith.constant 0 : i32
    %c0_i32_0 = arith.constant 0 : i32
    %c0_i32_1 = arith.constant 0 : i32
    return %c0_i32, %c0_i32_0 : i32, i32
  }
  func.func @transform_4(%arg0: i32) -> (i32, i32) {
    %c0_i32 = arith.constant 0 : i32
    %c0_i32_0 = arith.constant 0 : i32
    %c0_i32_1 = arith.constant 0 : i32
    return %c0_i32, %c0_i32_0 : i32, i32
  }
  func.func @transform_5(%arg0: i32) -> (i32, i32) {
    %c0_i32 = arith.constant 0 : i32
    %c0_i32_0 = arith.constant 0 : i32
    %c0_i32_1 = arith.constant 0 : i32
    return %c0_i32, %c0_i32_0 : i32, i32
  }
  func.func @transform_6(%arg0: i32) -> (i32, i32) {
    %c0_i32 = arith.constant 0 : i32
    %c0_i32_0 = arith.constant 0 : i32
    %c0_i32_1 = arith.constant 0 : i32
    return %c0_i32, %c0_i32_0 : i32, i32
  }
  func.func @transform_7(%arg0: i32) -> (i32, i32) {
    %c0_i32 = arith.constant 0 : i32
    %c0_i32_0 = arith.constant 0 : i32
    %c0_i32_1 = arith.constant 0 : i32
    return %c0_i32, %c0_i32_0 : i32, i32
  }
  func.func @transform_8(%arg0: i32) -> (i32, i32) {
    %c0_i32 = arith.constant 0 : i32
    %c0_i32_0 = arith.constant 0 : i32
    %c0_i32_1 = arith.constant 0 : i32
    return %c0_i32, %c0_i32_0 : i32, i32
  }
  func.func @transform_9(%arg0: i32) -> (i32, i32) {
    %c0_i32 = arith.constant 0 : i32
    %c0_i32_0 = arith.constant 0 : i32
    return %arg0, %c0_i32 : i32, i32
  }
  func.func @transform_10(%arg0: i32) -> (i32, i32) {
    %c0_i32 = arith.constant 0 : i32
    %c0_i32_0 = arith.constant 0 : i32
    return %arg0, %c0_i32 : i32, i32
  }
}

</mosaic_0001>

<bundles_post_ra>
// kernel: tpu_custom_call.1
= control target key start
LH: loop header
LB: loop body
LE: loop exit
PB: predicated region body
PF: predicated region fallthrough
CT: control target
= control target key end

     0   :  { %16 = vsyncpa [#allocation3], 0  ;;  %s3787_s0 = inlined_call_operand.vmem [shape: f32[8,784], index: 0, kind: input, shape index: {}]   ;;  %s3788_s1 = inlined_call_operand.vmem [shape: bf16[784,256], index: 1, kind: input, shape index: {}]   ;;  %s3789_s2 = inlined_call_operand.vmem [shape: f32[1,256], index: 2, kind: input, shape index: {}]   ;;  %s3790_s3 = inlined_call_operand.vmem [shape: bf16[256,128], index: 3, kind: input, shape index: {}]   ;;  %s3791_s4 = inlined_call_operand.vmem [shape: f32[1,128], index: 4, kind: input, shape index: {}]   ;;  %s3792_s5 = inlined_call_operand.vmem [shape: bf16[128,256], index: 5, kind: input, shape index: {}]   ;;  %s3793_s6 = inlined_call_operand.vmem [shape: f32[1,256], index: 6, kind: input, shape index: {}]   ;;  %s3794_s7 = inlined_call_operand.vmem [shape: bf16[256,784], index: 7, kind: input, shape index: {}]   ;;  %s3795_s8 = inlined_call_operand.vmem [shape: f32[1,784], index: 8, kind: input, shape index: {}]   ;;  %s3796_s9 = inlined_call_operand.hbm [shape: bf16[8,8], index: 9, kind: output, shape index: {0}]   ;;  %s3797_s10 = inlined_call_operand.hbm [shape: bf16[8,784], index: 10, kind: output, shape index: {1}]  }
   0x1   :  { %v2483_v0 = vld [vmem:[%s3788_s1 + $0x4] ss:$8 sps:$4 sm:$0xff]   ;;  %v2485_v1 = vld [vmem:[%s3788_s1] ss:$8 sps:$4 sm:$0xff]   ;;  %v2486_v2 = vld [vmem:[%s3788_s1 + $0x14] ss:$8 sps:$4 sm:$0xff]  }
   0x2   :  { %655 = vmatprep.subr.bf16.mxu0 %v2483_v0  ;;  %v2488_v3 = vld [vmem:[%s3788_s1 + $0x10] ss:$8 sps:$4 sm:$0xff]   ;;  %v2489_v4 = vld [vmem:[%s3788_s1 + $0x24] ss:$8 sps:$4 sm:$0xff]   ;;  %v2491_v5 = vld [vmem:[%s3788_s1 + $0x20] ss:$8 sps:$4 sm:$0xff]  }
   0x3   :  { %656 = vmatpush1.bf16.msra.mxu0 %v2485_v1  ;;  %v2492_v6 = vld [vmem:[%s3788_s1 + $0x34] ss:$8 sps:$4 sm:$0xff]   ;;  %v2494_v7 = vld [vmem:[%s3788_s1 + $0x30] ss:$8 sps:$4 sm:$0xff]   ;;  %v2495_v8 = vld [vmem:[%s3788_s1 + $0x44] ss:$8 sps:$4 sm:$0xff]  }
   0x4   :  { %657 = vmatprep.subr.bf16.mxu0 %v2486_v2  ;;  %v2497_v9 = vld [vmem:[%s3788_s1 + $0x40] ss:$8 sps:$4 sm:$0xff]   ;;  %v2498_v10 = vld [vmem:[%s3788_s1 + $0x54] ss:$8 sps:$4 sm:$0xff]   ;;  %v2500_v11 = vld [vmem:[%s3788_s1 + $0x50] ss:$8 sps:$4 sm:$0xff]  }
   0x5   :  { %v2501_v12 = vld [vmem:[%s3788_s1 + $0x64] ss:$8 sps:$4 sm:$0xff]   ;;  %v2503_v15 = vld [vmem:[%s3788_s1 + $0x60] ss:$8 sps:$4 sm:$0xff]   ;;  %v2504_v16 = vld [vmem:[%s3788_s1 + $0x74] ss:$8 sps:$4 sm:$0xff]  }
   0x6   :  { %v38_v13 = vld [vmem:[%s3787_s0 + $0x8] sm:$0xff]  ;;  %v2506_v17 = vld [vmem:[%s3788_s1 + $0x70] ss:$8 sps:$4 sm:$0xff]   ;;  %v2510_v20 = vld [vmem:[%s3788_s1 + $0x94] ss:$8 sps:$4 sm:$0xff]  }
   0x7   :  { %658 = vmatpush1.bf16.msra.mxu0 %v2488_v3  ;;  %v45_v14 = vpack.c.bf16 %v38_v13, %v38_v13  ;;  %v2507_v18 = vld [vmem:[%s3788_s1 + $0x84] ss:$8 sps:$4 sm:$0xff]   ;;  %v2509_v19 = vld [vmem:[%s3788_s1 + $0x80] ss:$8 sps:$4 sm:$0xff]   ;;  %v2512_v21 = vld [vmem:[%s3788_s1 + $0x90] ss:$8 sps:$4 sm:$0xff]  }
   0x8   :  { %659 = vmatprep.subr.bf16.mxu0 %v2489_v4  ;;  %v2513_v22 = vld [vmem:[%s3788_s1 + $0xa4] ss:$8 sps:$4 sm:$0xff]   ;;  %v2515_v23 = vld [vmem:[%s3788_s1 + $0xa0] ss:$8 sps:$4 sm:$0xff]   ;;  %v2516_v24 = vld [vmem:[%s3788_s1 + $0xb4] ss:$8 sps:$4 sm:$0xff]  }
   0x9   :  { %687 = vmatprep.mubr.bf16.mxu0 %v45_v14  ;;  %v2518_v25 = vld [vmem:[%s3788_s1 + $0xb0] ss:$8 sps:$4 sm:$0xff]   ;;  %v2519_v26 = vld [vmem:[%s3788_s1 + $0xc4] ss:$8 sps:$4 sm:$0xff]   ;;  %v2521_v27 = vld [vmem:[%s3788_s1 + $0xc0] ss:$8 sps:$4 sm:$0xff]  }
   0xa   :  { %v2522_v28 = vld [vmem:[%s3788_s1 + $0xd4] ss:$8 sps:$4 sm:$0xff]   ;;  %v2524_v29 = vld [vmem:[%s3788_s1 + $0xd0] ss:$8 sps:$4 sm:$0xff]   ;;  %v2525_v30 = vld [vmem:[%s3788_s1 + $0xe4] ss:$8 sps:$4 sm:$0xff]  }
   0xb   :  { %660 = vmatpush1.bf16.msra.mxu0 %v2491_v5  ;;  %v2527_v31 = vld [vmem:[%s3788_s1 + $0xe0] ss:$8 sps:$4 sm:$0xff]   ;;  %v2528_v32 = vld [vmem:[%s3788_s1 + $0xf4] ss:$8 sps:$4 sm:$0xff]   ;;  %v2530_v33 = vld [vmem:[%s3788_s1 + $0xf0] ss:$8 sps:$4 sm:$0xff]  }
   0xc   :  { %661 = vmatprep.subr.bf16.mxu0 %v2492_v6  ;;  %v2533_v34 = vld [vmem:[%s3788_s1 + $0x104] ss:$8 sps:$4 sm:$0xff]   ;;  %v40_v36 = vld [vmem:[%s3787_s0 + $0x18] sm:$0xff]  ;;  %v2531_v38 = vld [vmem:[%s3788_s1 + $0x100] ss:$8 sps:$4 sm:$0xff]  }
   0xd   :  { %v37_v35 = vld [vmem:[%s3787_s0] sm:$0xff]  ;;  %v47_v39 = vpack.c.bf16 %v40_v36, %v40_v36  ;;  %v2536_v40 = vld [vmem:[%s3788_s1 + $0x114] ss:$8 sps:$4 sm:$0xff]   ;;  %v2534_v41 = vld [vmem:[%s3788_s1 + $0x110] ss:$8 sps:$4 sm:$0xff]  }
   0xe   :  { %v44_v37 = vpack.c.bf16 %v37_v35, %v37_v35  ;;  %v2539_v42 = vld [vmem:[%s3788_s1 + $0x124] ss:$8 sps:$4 sm:$0xff]   ;;  %v2537_v43 = vld [vmem:[%s3788_s1 + $0x120] ss:$8 sps:$4 sm:$0xff]   ;;  %v2542_v44 = vld [vmem:[%s3788_s1 + $0x134] ss:$8 sps:$4 sm:$0xff]  }
   0xf   :  { %662 = vmatpush1.bf16.msra.mxu0 %v2494_v7  ;;  %v2540_v45 = vld [vmem:[%s3788_s1 + $0x130] ss:$8 sps:$4 sm:$0xff]   ;;  %v2545_v46 = vld [vmem:[%s3788_s1 + $0x144] ss:$8 sps:$4 sm:$0xff]   ;;  %v2543_v50 = vld [vmem:[%s3788_s1 + $0x140] ss:$8 sps:$4 sm:$0xff]  }
  0x10   :  { %663 = vmatprep.subr.bf16.mxu0 %v2495_v8  ;;  %v2630_v47 = vld [vmem:[%s3790_s3 + $0x40] sm:$0xff]   ;;  %v2632_v49 = vld [vmem:[%s3790_s3 + $0x48] sm:$0xff]   ;;  %v2548_v51 = vld [vmem:[%s3788_s1 + $0x154] ss:$8 sps:$4 sm:$0xff]  }
  0x11   :  { %v2631_v48 = vld [vmem:[%s3790_s3] sm:$0xff]   ;;  %2422 = vmatprep.subr.bf16.mxu1 %v2630_v47  ;;  %v2546_v52 = vld [vmem:[%s3788_s1 + $0x150] ss:$8 sps:$4 sm:$0xff]   ;;  %v2633_v53 = vld [vmem:[%s3790_s3 + $0x8] sm:$0xff]  }
  0x12   :  { %2423 = vmatpush3.bf16.msra.mxu1 %v2631_v48  ;;  %v2551_v54 = vld [vmem:[%s3788_s1 + $0x164] ss:$8 sps:$4 sm:$0xff]   ;;  %v2634_v55 = vld [vmem:[%s3790_s3 + $0x50] sm:$0xff]   ;;  %v2636_v57 = vld [vmem:[%s3790_s3 + $0x58] sm:$0xff]  }
  0x13   :  { %664 = vmatpush1.bf16.msra.mxu0 %v2497_v9  ;;  %2424 = vmatprep.subr.bf16.mxu1 %v2632_v49  ;;  %v2635_v56 = vld [vmem:[%s3790_s3 + $0x10] sm:$0xff]   ;;  %v2549_v58 = vld [vmem:[%s3788_s1 + $0x160] ss:$8 sps:$4 sm:$0xff]   ;;  %v2637_v60 = vld [vmem:[%s3790_s3 + $0x18] sm:$0xff]  }
  0x14   :  { %665 = vmatprep.subr.bf16.mxu0 %v2498_v10  ;;  %v2554_v59 = vld [vmem:[%s3788_s1 + $0x174] ss:$8 sps:$4 sm:$0xff]   ;;  %v2638_v61 = vld [vmem:[%s3790_s3 + $0x60] sm:$0xff]   ;;  %v2552_v62 = vld [vmem:[%s3788_s1 + $0x170] ss:$8 sps:$4 sm:$0xff]  }
  0x15   :  { %v2557_v63 = vld [vmem:[%s3788_s1 + $0x184] ss:$8 sps:$4 sm:$0xff]   ;;  %v2555_v2 = vld [vmem:[%s3788_s1 + $0x180] ss:$8 sps:$4 sm:$0xff]   ;;  %v2560_v3 = vld [vmem:[%s3788_s1 + $0x194] ss:$8 sps:$4 sm:$0xff]  }
  0x16   :  { %2425 = vmatpush3.bf16.msra.mxu1 %v2633_v53  ;;  %v2639_v0 = vld [vmem:[%s3790_s3 + $0x20] sm:$0xff]   ;;  %v2640_v1 = vld [vmem:[%s3790_s3 + $0x68] sm:$0xff]   ;;  %v2558_v5 = vld [vmem:[%s3788_s1 + $0x190] ss:$8 sps:$4 sm:$0xff]  }
  0x17   :  { %666 = vmatpush1.bf16.msra.mxu0 %v2500_v11  ;;  %2426 = vmatprep.subr.bf16.mxu1 %v2634_v55  ;;  %v2641_v4 = vld [vmem:[%s3790_s3 + $0x28] sm:$0xff]   ;;  %v2566_v8 = vld [vmem:[%s3788_s1 + $0x1b4] ss:$8 sps:$4 sm:$0xff]   ;;  %v2564_v9 = vld [vmem:[%s3788_s1 + $0x1b0] ss:$8 sps:$4 sm:$0xff]  }
  0x18   :  { %667 = vmatprep.subr.bf16.mxu0 %v2501_v12  ;;  %v2563_v6 = vld [vmem:[%s3788_s1 + $0x1a4] ss:$8 sps:$4 sm:$0xff]   ;;  %v2561_v7 = vld [vmem:[%s3788_s1 + $0x1a0] ss:$8 sps:$4 sm:$0xff]   ;;  %v2572_v12 = vld [vmem:[%s3788_s1 + $0x1d4] ss:$8 sps:$4 sm:$0xff]  }
  0x19   :  { %v2569_v10 = vld [vmem:[%s3788_s1 + $0x1c4] ss:$8 sps:$4 sm:$0xff]   ;;  %v2567_v11 = vld [vmem:[%s3788_s1 + $0x1c0] ss:$8 sps:$4 sm:$0xff]   ;;  %v2570_v13 = vld [vmem:[%s3788_s1 + $0x1d0] ss:$8 sps:$4 sm:$0xff]  }
  0x1a   :  { %2427 = vmatpush3.bf16.msra.mxu1 %v2635_v56  ;;  %v2575_v14 = vld [vmem:[%s3788_s1 + $0x1e4] ss:$8 sps:$4 sm:$0xff]  }
  0x1b   :  { %668 = vmatpush1.bf16.msra.mxu0 %v2503_v15  ;;  %2428 = vmatprep.subr.bf16.mxu1 %v2636_v57  ;;  %v2573_v15 = vld [vmem:[%s3788_s1 + $0x1e0] ss:$8 sps:$4 sm:$0xff]  }
  0x1c   :  { %669 = vmatprep.subr.bf16.mxu0 %v2504_v16  ;;  %v2578_v16 = vld [vmem:[%s3788_s1 + $0x1f4] ss:$8 sps:$4 sm:$0xff]  }
  0x1e   :  { %2429 = vmatpush3.bf16.msra.mxu1 %v2637_v60 }
  0x1f   :  { %670 = vmatpush1.bf16.msra.mxu0 %v2506_v17  ;;  %2430 = vmatprep.subr.bf16.mxu1 %v2638_v61  ;;  %v2576_v17 = vld [vmem:[%s3788_s1 + $0x1f0] ss:$8 sps:$4 sm:$0xff]  }
  0x20   :  { %671 = vmatprep.subr.bf16.mxu0 %v2507_v18  ;;  %v39_v18 = vld [vmem:[%s3787_s0 + $0x10] sm:$0xff] }
  0x22   :  { %2431 = vmatpush3.bf16.msra.mxu1 %v2639_v0 }
  0x23   :  { %672 = vmatpush1.bf16.msra.mxu0 %v2509_v19  ;;  %2432 = vmatprep.subr.bf16.mxu1 %v2640_v1  ;;  %v2581_v19 = vld [vmem:[%s3788_s1 + $0x204] ss:$8 sps:$4 sm:$0xff]  }
  0x24   :  { %673 = vmatprep.subr.bf16.mxu0 %v2510_v20  ;;  %v42_v20 = vld [vmem:[%s3787_s0 + $0x28] sm:$0xff] }
  0x26   :  { %2433 = vmatpush3.bf16.msra.mxu1 %v2641_v4 }
  0x27   :  { %674 = vmatpush1.bf16.msra.mxu0 %v2512_v21  ;;  %v2579_v21 = vld [vmem:[%s3788_s1 + $0x200] ss:$8 sps:$4 sm:$0xff]  }
  0x28   :  { %675 = vmatprep.subr.bf16.mxu0 %v2513_v22  ;;  %v46_v22 = vpack.c.bf16 %v39_v18, %v39_v18 }
  0x2b   :  { %676 = vmatpush1.bf16.msra.mxu0 %v2515_v23  ;;  %v2584_v23 = vld [vmem:[%s3788_s1 + $0x214] ss:$8 sps:$4 sm:$0xff]  }
  0x2c   :  { %677 = vmatprep.subr.bf16.mxu0 %v2516_v24  ;;  %v49_v24 = vpack.c.bf16 %v42_v20, %v42_v20 }
  0x2f   :  { %678 = vmatpush1.bf16.msra.mxu0 %v2518_v25 }
  0x30   :  { %679 = vmatprep.subr.bf16.mxu0 %v2519_v26 }
  0x33   :  { %680 = vmatpush1.bf16.msra.mxu0 %v2521_v27 }
  0x34   :  { %681 = vmatprep.subr.bf16.mxu0 %v2522_v28 }
  0x37   :  { %682 = vmatpush1.bf16.msra.mxu0 %v2524_v29 }
  0x38   :  { %683 = vmatprep.subr.bf16.mxu0 %v2525_v30 }
  0x3b   :  { %684 = vmatpush1.bf16.msra.mxu0 %v2527_v31 }
  0x3c   :  { %685 = vmatprep.subr.bf16.mxu0 %v2528_v32 }
  0x3f   :  { %686 = vmatpush1.bf16.msra.mxu0 %v2530_v33 }
  0x40   :  { %696 = vmatprep.subr.bf16.mxu0 %v2533_v34 }
  0x42   :  { %688 = vmatmul.mubr.bf16.vlgmr.msra.gmra.mrb[0].mxu0 %v44_v37 }
  0x43   :  { %697 = vmatpush1.bf16.msra.mxu0 %v2531_v38  ;;  %728 = vmatprep.mubr.bf16.mxu0 %v47_v39 }
  0x44   :  { %698 = vmatprep.subr.bf16.mxu0 %v2536_v40 }
  0x47   :  { %699 = vmatpush1.bf16.msra.mxu0 %v2534_v41 }
  0x48   :  { %700 = vmatprep.subr.bf16.mxu0 %v2539_v42 }
  0x4b   :  { %701 = vmatpush1.bf16.msra.mxu0 %v2537_v43 }
  0x4c   :  { %702 = vmatprep.subr.bf16.mxu0 %v2542_v44 }
  0x4f   :  { %703 = vmatpush1.bf16.msra.mxu0 %v2540_v45 }
  0x50   :  { %704 = vmatprep.subr.bf16.mxu0 %v2545_v46 }
  0x53   :  { %705 = vmatpush1.bf16.msra.mxu0 %v2543_v50 }
  0x54   :  { %706 = vmatprep.subr.bf16.mxu0 %v2548_v51 }
  0x57   :  { %707 = vmatpush1.bf16.msra.mxu0 %v2546_v52 }
  0x58   :  { %708 = vmatprep.subr.bf16.mxu0 %v2551_v54 }
  0x5b   :  { %709 = vmatpush1.bf16.msra.mxu0 %v2549_v58 }
  0x5c   :  { %710 = vmatprep.subr.bf16.mxu0 %v2554_v59 }
  0x5f   :  { %711 = vmatpush1.bf16.msra.mxu0 %v2552_v62 }
  0x60   :  { %712 = vmatprep.subr.bf16.mxu0 %v2557_v63 }
  0x63   :  { %713 = vmatpush1.bf16.msra.mxu0 %v2555_v2 }
  0x64   :  { %714 = vmatprep.subr.bf16.mxu0 %v2560_v3 }
  0x67   :  { %715 = vmatpush1.bf16.msra.mxu0 %v2558_v5 }
  0x68   :  { %716 = vmatprep.subr.bf16.mxu0 %v2563_v6 }
  0x6b   :  { %717 = vmatpush1.bf16.msra.mxu0 %v2561_v7 }
  0x6c   :  { %718 = vmatprep.subr.bf16.mxu0 %v2566_v8 }
  0x6f   :  { %719 = vmatpush1.bf16.msra.mxu0 %v2564_v9 }
  0x70   :  { %720 = vmatprep.subr.bf16.mxu0 %v2569_v10 }
  0x73   :  { %721 = vmatpush1.bf16.msra.mxu0 %v2567_v11 }
  0x74   :  { %722 = vmatprep.subr.bf16.mxu0 %v2572_v12 }
  0x77   :  { %723 = vmatpush1.bf16.msra.mxu0 %v2570_v13 }
  0x78   :  { %724 = vmatprep.subr.bf16.mxu0 %v2575_v14 }
  0x7b   :  { %725 = vmatpush1.bf16.msra.mxu0 %v2573_v15 }
  0x7c   :  { %726 = vmatprep.subr.bf16.mxu0 %v2578_v16 }
  0x7f   :  { %727 = vmatpush1.bf16.msra.mxu0 %v2576_v17 }
  0x80   :  { %737 = vmatprep.subr.bf16.mxu0 %v2581_v19 }
  0x82   :  { %729 = vmatmul.mubr.bf16.vlgmr.msra.gmra.mrb[0].mxu0 %v46_v22 }
  0x83   :  { %17 = vsyncpa [#allocation5], 0  ;;  %738 = vmatpush1.bf16.msra.mxu0 %v2579_v21  ;;  %v2582_v25 = vld [vmem:[%s3788_s1 + $0x210] ss:$8 sps:$4 sm:$0xff]   ;;  %769 = vmatprep.mubr.bf16.mxu0 %v49_v24  ;;  %v2587_v26 = vld [vmem:[%s3788_s1 + $0x224] ss:$8 sps:$4 sm:$0xff]   ;;  %v151_v2 = vlaneseq }
  0x84   :  { %739 = vmatprep.subr.bf16.mxu0 %v2584_v23  ;;  %v2585_v27 = vld [vmem:[%s3788_s1 + $0x220] ss:$8 sps:$4 sm:$0xff]   ;;  %v2590_v28 = vld [vmem:[%s3788_s1 + $0x234] ss:$8 sps:$4 sm:$0xff]   ;;  %v2588_v29 = vld [vmem:[%s3788_s1 + $0x230] ss:$8 sps:$4 sm:$0xff]  }
  0x85   :  { %v2593_v30 = vld [vmem:[%s3788_s1 + $0x244] ss:$8 sps:$4 sm:$0xff]   ;;  %v2591_v31 = vld [vmem:[%s3788_s1 + $0x240] ss:$8 sps:$4 sm:$0xff]   ;;  %v2596_v32 = vld [vmem:[%s3788_s1 + $0x254] ss:$8 sps:$4 sm:$0xff]  }
  0x86   :  { %v2594_v33 = vld [vmem:[%s3788_s1 + $0x250] ss:$8 sps:$4 sm:$0xff]   ;;  %v2599_v34 = vld [vmem:[%s3788_s1 + $0x264] ss:$8 sps:$4 sm:$0xff]   ;;  %v2597_v35 = vld [vmem:[%s3788_s1 + $0x260] ss:$8 sps:$4 sm:$0xff]  }
  0x87   :  { %740 = vmatpush1.bf16.msra.mxu0 %v2582_v25  ;;  %v2602_v36 = vld [vmem:[%s3788_s1 + $0x274] ss:$8 sps:$4 sm:$0xff]   ;;  %v2600_v37 = vld [vmem:[%s3788_s1 + $0x270] ss:$8 sps:$4 sm:$0xff]   ;;  %v2605_v38 = vld [vmem:[%s3788_s1 + $0x284] ss:$8 sps:$4 sm:$0xff]  }
  0x88   :  { %741 = vmatprep.subr.bf16.mxu0 %v2587_v26  ;;  %v2603_v39 = vld [vmem:[%s3788_s1 + $0x280] ss:$8 sps:$4 sm:$0xff]   ;;  %v2608_v40 = vld [vmem:[%s3788_s1 + $0x294] ss:$8 sps:$4 sm:$0xff]   ;;  %v2606_v41 = vld [vmem:[%s3788_s1 + $0x290] ss:$8 sps:$4 sm:$0xff]  }
  0x89   :  { %v2611_v42 = vld [vmem:[%s3788_s1 + $0x2a4] ss:$8 sps:$4 sm:$0xff]   ;;  %v2609_v43 = vld [vmem:[%s3788_s1 + $0x2a0] ss:$8 sps:$4 sm:$0xff]   ;;  %v2614_v44 = vld [vmem:[%s3788_s1 + $0x2b4] ss:$8 sps:$4 sm:$0xff]  }
  0x8a   :  { %v2612_v45 = vld [vmem:[%s3788_s1 + $0x2b0] ss:$8 sps:$4 sm:$0xff]   ;;  %v2617_v46 = vld [vmem:[%s3788_s1 + $0x2c4] ss:$8 sps:$4 sm:$0xff]   ;;  %v2615_v47 = vld [vmem:[%s3788_s1 + $0x2c0] ss:$8 sps:$4 sm:$0xff]  }
  0x8b   :  { %742 = vmatpush1.bf16.msra.mxu0 %v2585_v27  ;;  %v2620_v48 = vld [vmem:[%s3788_s1 + $0x2d4] ss:$8 sps:$4 sm:$0xff]   ;;  %v2618_v49 = vld [vmem:[%s3788_s1 + $0x2d0] ss:$8 sps:$4 sm:$0xff]   ;;  %v2623_v50 = vld [vmem:[%s3788_s1 + $0x2e4] ss:$8 sps:$4 sm:$0xff]  }
  0x8c   :  { %743 = vmatprep.subr.bf16.mxu0 %v2590_v28  ;;  %v2621_v51 = vld [vmem:[%s3788_s1 + $0x2e0] ss:$8 sps:$4 sm:$0xff]   ;;  %v2626_v52 = vld [vmem:[%s3788_s1 + $0x2f4] ss:$8 sps:$4 sm:$0xff]   ;;  %v2624_v53 = vld [vmem:[%s3788_s1 + $0x2f0] ss:$8 sps:$4 sm:$0xff]  }
  0x8d   :  { %v41_v54 = vld [vmem:[%s3787_s0 + $0x20] sm:$0xff]  ;;  %v2906_v58 = vmov 0   ;;  %v43_v59 = vld [vmem:[%s3787_s0 + $0x30] sm:$0xff]  ;;  %vm651_vm0 = vcmask 130048   ;;  %v2644_v63 = vld [vmem:[%s3790_s3 + $0x78] sm:$0xff]   ;;  %v3330_v3 = vshrl.u32 %v151_v2, 7 }
  0x8e   :  { %v2629_v55 = vld [vmem:[%s3788_s1 + $0x304] ss:$8 sps:$4 sm:$0xff]   ;;  %v48_v56 = vpack.c.bf16 %v41_v54, %v41_v54  ;;  %v2627_v57 = vld [vmem:[%s3788_s1 + $0x300] ss:$8 sps:$4 sm:$0xff]   ;;  %v50_v60 = vpack.c.bf16 %v43_v59, %v43_v59  ;;  %v2642_v61 = vld [vmem:[%s3790_s3 + $0x70] sm:$0xff]   ;;  %vm2099_vm1 = vcmask 60416  }
  0x8f   :  { %744 = vmatpush1.bf16.msra.mxu0 %v2588_v29  ;;  %v2643_v62 = vld [vmem:[%s3790_s3 + $0x30] sm:$0xff]   ;;  %2434 = vmatprep.subr.bf16.mxu1 %v2642_v61  ;;  %v2645_v0 = vld [vmem:[%s3790_s3 + $0x38] sm:$0xff]   ;;  %v2648_v1 = vld [vmem:[%s3792_s5 + $0x4] ss:$8 sps:$4 sm:$0xff]   ;;  %v3333_v4 = vsub.s32 0, %v3330_v3  ;;  %v3339_v6 = vsub.s32 1, %v3330_v3 }
  0x90   :  { %745 = vmatprep.subr.bf16.mxu0 %v2593_v30  ;;  %2435 = vmatpush3.bf16.msra.mxu1 %v2643_v62  ;;  %v149_v5 = vld [vmem:[%s3789_s2] sm:$0x3]  ;;  %v2651_v20 = vld [vmem:[%s3792_s5 + $0x14] ss:$8 sps:$4 sm:$0xff]   ;;  %v2649_v21 = vld [vmem:[%s3792_s5 + $0x10] ss:$8 sps:$4 sm:$0xff]  }
  0x91   :  { %2436 = vmatprep.subr.bf16.mxu1 %v2644_v63  ;;  %v154_v7 = vrot.slane %v149_v5, %v3333_v4  ;;  %v158_v8 = vrot.slane %v149_v5, %v3339_v6  ;;  %v2646_v18 = vld [vmem:[%s3792_s5] ss:$8 sps:$4 sm:$0xff]   ;;  %v2654_v22 = vld [vmem:[%s3792_s5 + $0x24] ss:$8 sps:$4 sm:$0xff]   ;;  %v2657_v24 = vld [vmem:[%s3792_s5 + $0x34] ss:$8 sps:$4 sm:$0xff]  }
  0x92   :  { %v2652_v23 = vld [vmem:[%s3792_s5 + $0x20] ss:$8 sps:$4 sm:$0xff]   ;;  %v2655_v25 = vld [vmem:[%s3792_s5 + $0x30] ss:$8 sps:$4 sm:$0xff]   ;;  %v2660_v26 = vld [vmem:[%s3792_s5 + $0x44] ss:$8 sps:$4 sm:$0xff]  }
  0x93   :  { %746 = vmatpush1.bf16.msra.mxu0 %v2591_v31  ;;  %v2658_v27 = vld [vmem:[%s3792_s5 + $0x40] ss:$8 sps:$4 sm:$0xff]   ;;  %v2663_v28 = vld [vmem:[%s3792_s5 + $0x54] ss:$8 sps:$4 sm:$0xff]   ;;  %v2661_v29 = vld [vmem:[%s3792_s5 + $0x50] ss:$8 sps:$4 sm:$0xff]  }
  0x94   :  { %747 = vmatprep.subr.bf16.mxu0 %v2596_v32  ;;  %2437 = vmatpush3.bf16.msra.mxu1 %v2645_v0  ;;  %v2666_v30 = vld [vmem:[%s3792_s5 + $0x64] ss:$8 sps:$4 sm:$0xff]   ;;  %v2664_v31 = vld [vmem:[%s3792_s5 + $0x60] ss:$8 sps:$4 sm:$0xff]   ;;  %v2669_v32 = vld [vmem:[%s3792_s5 + $0x74] ss:$8 sps:$4 sm:$0xff]  }
  0x95   :  { %1108 = vmatprep.subr.bf16.mxu1 %v2648_v1  ;;  %v2678_v59 = vld [vmem:[%s3794_s7 + $0x74] ss:$28 sps:$4 sm:$0xff]   ;;  %v2681_v61 = vld [vmem:[%s3794_s7 + $0xac] ss:$28 sps:$4 sm:$0xff]   ;;  %v2684_v63 = vld [vmem:[%s3794_s7 + $0xe4] ss:$28 sps:$4 sm:$0xff]  }
  0x96   :  { %v2679_v62 = vld [vmem:[%s3794_s7 + $0xa8] ss:$28 sps:$4 sm:$0xff]   ;;  %v2682_v0 = vld [vmem:[%s3794_s7 + $0xe0] ss:$28 sps:$4 sm:$0xff]   ;;  %v2685_v2 = vld [vmem:[%s3794_s7 + $0x118] ss:$28 sps:$4 sm:$0xff]  }
  0x97   :  { %748 = vmatpush1.bf16.msra.mxu0 %v2594_v33  ;;  %v2667_v33 = vld [vmem:[%s3792_s5 + $0x70] ss:$8 sps:$4 sm:$0xff]  }
  0x98   :  { %749 = vmatprep.subr.bf16.mxu0 %v2599_v34  ;;  %v2672_v34 = vld [vmem:[%s3794_s7 + $0x4] ss:$28 sps:$4 sm:$0xff]   ;;  %v2687_v1 = vld [vmem:[%s3794_s7 + $0x11c] ss:$28 sps:$4 sm:$0xff]   ;;  %v2690_v5 = vld [vmem:[%s3794_s7 + $0x154] ss:$28 sps:$4 sm:$0xff]  }
  0x9b   :  { %750 = vmatpush1.bf16.msra.mxu0 %v2597_v35  ;;  %v2697_v35 = vld [vmem:[%s3794_s7 + $0x1d8] ss:$28 sps:$4 sm:$0xff]  }
  0x9c   :  { %751 = vmatprep.subr.bf16.mxu0 %v2602_v36  ;;  %v2698_v36 = vld [vmem:[%s3794_s7 + $0x18] ss:$28 sps:$4 sm:$0xff]  }
  0x9f   :  { %752 = vmatpush1.bf16.msra.mxu0 %v2600_v37  ;;  %v2702_v37 = vld [vmem:[%s3794_s7 + $0x210] ss:$28 sps:$4 sm:$0xff]  }
  0xa0   :  { %753 = vmatprep.subr.bf16.mxu0 %v2605_v38  ;;  %v2703_v38 = vld [vmem:[%s3794_s7 + $0x50] ss:$28 sps:$4 sm:$0xff]  }
  0xa3   :  { %754 = vmatpush1.bf16.msra.mxu0 %v2603_v39  ;;  %v2707_v39 = vld [vmem:[%s3794_s7 + $0x248] ss:$28 sps:$4 sm:$0xff]  }
  0xa4   :  { %755 = vmatprep.subr.bf16.mxu0 %v2608_v40  ;;  %v2708_v40 = vld [vmem:[%s3794_s7 + $0x88] ss:$28 sps:$4 sm:$0xff]  }
  0xa7   :  { %756 = vmatpush1.bf16.msra.mxu0 %v2606_v41  ;;  %v2712_v41 = vld [vmem:[%s3794_s7 + $0x280] ss:$28 sps:$4 sm:$0xff]  }
  0xa8   :  { %757 = vmatprep.subr.bf16.mxu0 %v2611_v42  ;;  %v2713_v42 = vld [vmem:[%s3794_s7 + $0xc0] ss:$28 sps:$4 sm:$0xff]  }
  0xab   :  { %758 = vmatpush1.bf16.msra.mxu0 %v2609_v43  ;;  %v2717_v43 = vld [vmem:[%s3794_s7 + $0x2b8] ss:$28 sps:$4 sm:$0xff]  }
  0xac   :  { %759 = vmatprep.subr.bf16.mxu0 %v2614_v44  ;;  %v2718_v44 = vld [vmem:[%s3794_s7 + $0xf8] ss:$28 sps:$4 sm:$0xff]  }
  0xaf   :  { %760 = vmatpush1.bf16.msra.mxu0 %v2612_v45  ;;  %v2722_v45 = vld [vmem:[%s3794_s7 + $0x2f0] ss:$28 sps:$4 sm:$0xff]  }
  0xb0   :  { %761 = vmatprep.subr.bf16.mxu0 %v2617_v46  ;;  %v2723_v46 = vld [vmem:[%s3794_s7 + $0x130] ss:$28 sps:$4 sm:$0xff]  }
  0xb3   :  { %762 = vmatpush1.bf16.msra.mxu0 %v2615_v47 }
  0xb4   :  { %763 = vmatprep.subr.bf16.mxu0 %v2620_v48  ;;  %v2262_v48 = vld [vmem:[%s3791_s4] ss:$0 sm:$0xff] }
  0xb7   :  { %764 = vmatpush1.bf16.msra.mxu0 %v2618_v49 }
  0xb8   :  { %765 = vmatprep.subr.bf16.mxu0 %v2623_v50 }
  0xbb   :  { %766 = vmatpush1.bf16.msra.mxu0 %v2621_v51 }
  0xbc   :  { %767 = vmatprep.subr.bf16.mxu0 %v2626_v52 }
  0xbf   :  { %768 = vmatpush1.bf16.msra.mxu0 %v2624_v53 }
  0xc0   :  { %778 = vmatprep.subr.bf16.mxu0 %v2629_v55  ;;  %v2670_v55 = vld [vmem:[%s3794_s7] ss:$28 sps:$4 sm:$0xff]  }
  0xc2   :  { %770 = vmatmul.mubr.bf16.vlgmr.msra.gmra.mrb[0].mxu0 %v48_v56 }
  0xc3   :  { %779 = vmatpush1.bf16.msra.mxu0 %v2627_v57  ;;  %810 = vmatprep.mubr.bf16.mxu0 %v2906_v58  ;;  %v2675_v57 = vld [vmem:[%s3794_s7 + $0x3c] ss:$28 sps:$4 sm:$0xff]  }
  0xc4   :  { %2444 = vmatprep.subr.bf16.mxu0 %v2697_v35 }
  0xce   :  { %2261 = vmatmul.mubr.msk.bf16.vlgmr.msra.gmra.mrb[0].mxu0 %vm651_vm0, %v50_v60  ;;  %v2676_v60 = vld [vmem:[%s3794_s7 + $0x70] ss:$28 sps:$4 sm:$0xff]  }
  0xcf   :  { %2445 = vmatpush3.bf16.msra.mxu0 %v2698_v36 }
  0xd0   :  { %2446 = vmatprep.subr.bf16.mxu0 %v2702_v37 }
  0xd3   :  { %2447 = vmatpush3.bf16.msra.mxu0 %v2703_v38 }
  0xd4   :  { %2448 = vmatprep.subr.bf16.mxu0 %v2707_v39 }
  0xd7   :  { %2449 = vmatpush3.bf16.msra.mxu0 %v2708_v40 }
  0xd8   :  { %2450 = vmatprep.subr.bf16.mxu0 %v2712_v41 }
  0xdb   :  { %2451 = vmatpush3.bf16.msra.mxu0 %v2713_v42 }
  0xdc   :  { %2452 = vmatprep.subr.bf16.mxu0 %v2717_v43  ;;  %v2734_v43 = vld [vmem:[%s3794_s7 + $0x8] ss:$28 sps:$4 sm:$0xff]  }
  0xdf   :  { %2453 = vmatpush3.bf16.msra.mxu0 %v2718_v44 }
  0xe0   :  { %2454 = vmatprep.subr.bf16.mxu0 %v2722_v45  ;;  %v2739_v45 = vld [vmem:[%s3794_s7 + $0x44] ss:$28 sps:$4 sm:$0xff]  }
  0xe3   :  { %2455 = vmatpush3.bf16.msra.mxu0 %v2723_v46  ;;  %v2737_v46 = vld [vmem:[%s3794_s7 + $0x40] ss:$28 sps:$4 sm:$0xff]  }
 0x1a1   :  { %v812_v9 = vpop.f32.mrb[0].mxu0 }
 0x1a2   :  { %v2466_v10 = vadd.f32 %v812_v9, %v154_v7  ;;  %v814_v11 = vpop.f32.mrb[1].mxu0  ;;  %v2688_v7 = vld [vmem:[%s3794_s7 + $0x150] ss:$28 sps:$4 sm:$0xff]   ;;  %v2691_v9 = vld [vmem:[%s3794_s7 + $0x188] ss:$28 sps:$4 sm:$0xff]  }
 0x1a3   :  { %v2467_v12 = vadd.f32 %v814_v11, %v158_v8  ;;  %v816_v13 = vpop.f32.mrb[2].mxu0  ;;  %v2693_v8 = vld [vmem:[%s3794_s7 + $0x18c] ss:$28 sps:$4 sm:$0xff]   ;;  %v2694_v11 = vld [vmem:[%s3794_s7 + $0x1c0] ss:$28 sps:$4 sm:$0xff]  }
 0x1a4   :  { %v819_v14 = vmax.f32 %v2466_v10, 0.0  ;;  %v817_v15 = vpop.f32.mrb[3].mxu0  ;;  %v2696_v10 = vld [vmem:[%s3794_s7 + $0x1c4] ss:$28 sps:$4 sm:$0xff]   ;;  %v2699_v13 = vld [vmem:[%s3794_s7 + $0x1f8] ss:$28 sps:$4 sm:$0xff]  }
 0x1a5   :  { %v820_v16 = vmax.f32 %v2467_v12, 0.0  ;;  %v2701_v12 = vld [vmem:[%s3794_s7 + $0x1fc] ss:$28 sps:$4 sm:$0xff]   ;;  %v2704_v15 = vld [vmem:[%s3794_s7 + $0x230] ss:$28 sps:$4 sm:$0xff]  }
 0x1a6   :  { %v821_v19 = vpack.c.bf16 %v819_v14, %v819_v14  ;;  %v2706_v14 = vld [vmem:[%s3794_s7 + $0x234] ss:$28 sps:$4 sm:$0xff]  }
 0x1a7   :  { %v822_v17 = vpack.c.bf16 %v820_v16, %v820_v16  ;;  %v2711_v16 = vld [vmem:[%s3794_s7 + $0x26c] ss:$28 sps:$4 sm:$0xff]  }
 0x1a9   :  { %990 = vmatprep.mubr.bf16.mxu1 %v822_v17  ;;  %v2709_v17 = vld [vmem:[%s3794_s7 + $0x268] ss:$28 sps:$4 sm:$0xff]  }
 0x1aa   :  { %991 = vmatmul.mubr.bf16.vlgmr.msra.gmra.mrb[0].mxu1 %v821_v19  ;;  %v2714_v19 = vld [vmem:[%s3794_s7 + $0x2a0] ss:$28 sps:$4 sm:$0xff]  }
 0x1ab   :  { %1109 = vmatpush1.bf16.msra.mxu1 %v2646_v18  ;;  %1140 = vmatprep.mubr.bf16.mxu1 %v2906_v58  ;;  %v2673_v58 = vld [vmem:[%s3794_s7 + $0x38] ss:$28 sps:$4 sm:$0xff]   ;;  %v2716_v18 = vld [vmem:[%s3794_s7 + $0x2a4] ss:$28 sps:$4 sm:$0xff]  }
 0x1ac   :  { %1110 = vmatprep.subr.bf16.mxu1 %v2651_v20  ;;  %v2721_v20 = vld [vmem:[%s3794_s7 + $0x2dc] ss:$28 sps:$4 sm:$0xff]  }
 0x1af   :  { %1111 = vmatpush1.bf16.msra.mxu1 %v2649_v21  ;;  %v2719_v21 = vld [vmem:[%s3794_s7 + $0x2d8] ss:$28 sps:$4 sm:$0xff]  }
 0x1b0   :  { %1112 = vmatprep.subr.bf16.mxu1 %v2654_v22  ;;  %v2726_v22 = vld [vmem:[%s3794_s7 + $0x314] ss:$28 sps:$4 sm:$0xff]  }
 0x1b3   :  { %1113 = vmatpush1.bf16.msra.mxu1 %v2652_v23  ;;  %v2724_v23 = vld [vmem:[%s3794_s7 + $0x310] ss:$28 sps:$4 sm:$0xff]  }
 0x1b4   :  { %1114 = vmatprep.subr.bf16.mxu1 %v2657_v24  ;;  %v2727_v24 = vld [vmem:[%s3794_s7 + $0x328] ss:$28 sps:$4 sm:$0xff]  }
 0x1b5   :  { %2456 = vmatprep.subr.bf16.mxu0 %v2727_v24  ;;  %v2799_v24 = vld [vmem:[%s3794_s7 + $0x12c] ss:$28 sps:$4 sm:$0xff]  }
 0x1b7   :  { %1115 = vmatpush1.bf16.msra.mxu1 %v2655_v25  ;;  %v2728_v25 = vld [vmem:[%s3794_s7 + $0x168] ss:$28 sps:$4 sm:$0xff]  }
 0x1b8   :  { %1116 = vmatprep.subr.bf16.mxu1 %v2660_v26  ;;  %2457 = vmatpush3.bf16.msra.mxu0 %v2728_v25  ;;  %v2731_v26 = vld [vmem:[%s3794_s7 + $0x34c] ss:$28 sps:$4 sm:$0xff]  }
 0x1b9   :  { %v2797_v25 = vld [vmem:[%s3794_s7 + $0x128] ss:$28 sps:$4 sm:$0xff]  }
 0x1bb   :  { %1117 = vmatpush1.bf16.msra.mxu1 %v2658_v27  ;;  %v2729_v27 = vld [vmem:[%s3794_s7 + $0x348] ss:$28 sps:$4 sm:$0xff]  }
 0x1bc   :  { %1118 = vmatprep.subr.bf16.mxu1 %v2663_v28  ;;  %v2732_v28 = vld [vmem:[%s3794_s7 + $0x360] ss:$28 sps:$4 sm:$0xff]  }
 0x1bd   :  { %2458 = vmatprep.subr.bf16.mxu0 %v2732_v28  ;;  %v2805_v28 = vld [vmem:[%s3794_s7 + $0x19c] ss:$28 sps:$4 sm:$0xff]  }
 0x1bf   :  { %1119 = vmatpush1.bf16.msra.mxu1 %v2661_v29  ;;  %v2733_v29 = vld [vmem:[%s3794_s7 + $0x1a0] ss:$28 sps:$4 sm:$0xff]  }
 0x1c0   :  { %1120 = vmatprep.subr.bf16.mxu1 %v2666_v30  ;;  %2459 = vmatpush3.bf16.msra.mxu0 %v2733_v29  ;;  %v2736_v30 = vld [vmem:[%s3794_s7 + $0xc] ss:$28 sps:$4 sm:$0xff]   ;;  %v2803_v29 = vld [vmem:[%s3794_s7 + $0x198] ss:$28 sps:$4 sm:$0xff]  }
 0x1c3   :  { %1121 = vmatpush1.bf16.msra.mxu1 %v2664_v31  ;;  %v1016_v31 = vld [vmem:[%s3793_s6] sm:$0x3] }
 0x1c4   :  { %1122 = vmatprep.subr.bf16.mxu1 %v2669_v32  ;;  %v1021_v32 = vrot.slane %v1016_v31, %v3333_v4 }
 0x1c7   :  { %1123 = vmatpush1.bf16.msra.mxu1 %v2667_v33  ;;  %v1025_v33 = vrot.slane %v1016_v31, %v3339_v6  ;;  %v2806_v31 = vld [vmem:[%s3794_s7 + $0x1d0] ss:$28 sps:$4 sm:$0xff]  }
 0x1c8   :  { %1894 = vmatprep.subr.bf16.mxu1 %v2672_v34 }
 0x27d   :  { %v2438_v47 = vpop.f32.mrb[0].mxu1 }
 0x27e   :  { %v2439_v49 = vpop.f32.mrb[1].mxu1 }
 0x27f   :  { %v2440_v50 = vadd.f32 %v2439_v49, %v2438_v47  ;;  %v2441_v51 = vpop.f32.mrb[2].mxu1  ;;  %v2742_v47 = vld [vmem:[%s3794_s7 + $0x7c] ss:$28 sps:$4 sm:$0xff]   ;;  %v2745_v49 = vld [vmem:[%s3794_s7 + $0xb4] ss:$28 sps:$4 sm:$0xff]  }
 0x280   :  { %v2442_v52 = vpop.f32.mrb[3].mxu1  ;;  %v2748_v51 = vld [vmem:[%s3794_s7 + $0xec] ss:$28 sps:$4 sm:$0xff]  }
 0x281   :  { %v993_v53 = vadd.f32 %v2440_v50, %v2262_v48  ;;  %v2740_v48 = vld [vmem:[%s3794_s7 + $0x78] ss:$28 sps:$4 sm:$0xff]   ;;  %v2743_v50 = vld [vmem:[%s3794_s7 + $0xb0] ss:$28 sps:$4 sm:$0xff]   ;;  %v2746_v52 = vld [vmem:[%s3794_s7 + $0xe8] ss:$28 sps:$4 sm:$0xff]  }
 0x283   :  { %v998_v54 = vmax.f32 %v993_v53, 0.0  ;;  %v2751_v53 = vld [vmem:[%s3794_s7 + $0x124] ss:$28 sps:$4 sm:$0xff]  }
 0x285   :  { %v999_v56 = vpack.c.bf16 %v998_v54, %v998_v54  ;;  %v2749_v54 = vld [vmem:[%s3794_s7 + $0x120] ss:$28 sps:$4 sm:$0xff]  }
 0x287   :  { %1141 = vmatmul.mubr.bf16.vlgmr.msra.gmra.mrb[4].mxu1 %v999_v56  ;;  %2100 = vst.msk [vmem:[#allocation2] sm:$0xf] %vm2099_vm1, %v999_v56  ;;  %v2752_v56 = vld [vmem:[%s3794_s7 + $0x158] ss:$28 sps:$4 sm:$0xff]  }
 0x288   :  { %1895 = vmatpush1.bf16.msra.mxu1 %v2670_v55  ;;  %v2754_v55 = vld [vmem:[%s3794_s7 + $0x15c] ss:$28 sps:$4 sm:$0xff]  }
 0x289   :  { %1896 = vmatprep.subr.bf16.mxu1 %v2675_v57  ;;  %v2757_v57 = vld [vmem:[%s3794_s7 + $0x194] ss:$28 sps:$4 sm:$0xff]  }
 0x28c   :  { %1897 = vmatpush1.bf16.msra.mxu1 %v2673_v58  ;;  %v2755_v58 = vld [vmem:[%s3794_s7 + $0x190] ss:$28 sps:$4 sm:$0xff]  }
 0x28d   :  { %1898 = vmatprep.subr.bf16.mxu1 %v2678_v59  ;;  %v2760_v59 = vld [vmem:[%s3794_s7 + $0x1cc] ss:$28 sps:$4 sm:$0xff]  }
 0x290   :  { %1899 = vmatpush1.bf16.msra.mxu1 %v2676_v60  ;;  %v2758_v60 = vld [vmem:[%s3794_s7 + $0x1c8] ss:$28 sps:$4 sm:$0xff]  }
 0x291   :  { %1900 = vmatprep.subr.bf16.mxu1 %v2681_v61  ;;  %v2763_v61 = vld [vmem:[%s3794_s7 + $0x204] ss:$28 sps:$4 sm:$0xff]  }
 0x294   :  { %1901 = vmatpush1.bf16.msra.mxu1 %v2679_v62  ;;  %v2761_v62 = vld [vmem:[%s3794_s7 + $0x200] ss:$28 sps:$4 sm:$0xff]  }
 0x295   :  { %1902 = vmatprep.subr.bf16.mxu1 %v2684_v63  ;;  %v2766_v63 = vld [vmem:[%s3794_s7 + $0x23c] ss:$28 sps:$4 sm:$0xff]  }
 0x298   :  { %1903 = vmatpush1.bf16.msra.mxu1 %v2682_v0  ;;  %v2764_v0 = vld [vmem:[%s3794_s7 + $0x238] ss:$28 sps:$4 sm:$0xff]  }
 0x299   :  { %1904 = vmatprep.subr.bf16.mxu1 %v2687_v1  ;;  %v2769_v1 = vld [vmem:[%s3794_s7 + $0x274] ss:$28 sps:$4 sm:$0xff]  }
 0x29c   :  { %1905 = vmatpush1.bf16.msra.mxu1 %v2685_v2  ;;  %v2767_v2 = vld [vmem:[%s3794_s7 + $0x270] ss:$28 sps:$4 sm:$0xff]  }
 0x29d   :  { %1906 = vmatprep.subr.bf16.mxu1 %v2690_v5  ;;  %v2772_v5 = vld [vmem:[%s3794_s7 + $0x2ac] ss:$28 sps:$4 sm:$0xff]  }
 0x2a0   :  { %1907 = vmatpush1.bf16.msra.mxu1 %v2688_v7  ;;  %v2770_v7 = vld [vmem:[%s3794_s7 + $0x2a8] ss:$28 sps:$4 sm:$0xff]  }
 0x2a1   :  { %1908 = vmatprep.subr.bf16.mxu1 %v2693_v8  ;;  %v2775_v8 = vld [vmem:[%s3794_s7 + $0x2e4] ss:$28 sps:$4 sm:$0xff]  }
 0x2a4   :  { %1909 = vmatpush1.bf16.msra.mxu1 %v2691_v9  ;;  %v2773_v9 = vld [vmem:[%s3794_s7 + $0x2e0] ss:$28 sps:$4 sm:$0xff]  }
 0x2a5   :  { %1910 = vmatprep.subr.bf16.mxu1 %v2696_v10  ;;  %v2778_v10 = vld [vmem:[%s3794_s7 + $0x31c] ss:$28 sps:$4 sm:$0xff]  }
 0x2a8   :  { %1911 = vmatpush1.bf16.msra.mxu1 %v2694_v11  ;;  %v2776_v11 = vld [vmem:[%s3794_s7 + $0x318] ss:$28 sps:$4 sm:$0xff]  }
 0x2a9   :  { %1912 = vmatprep.subr.bf16.mxu1 %v2701_v12  ;;  %v2781_v12 = vld [vmem:[%s3794_s7 + $0x354] ss:$28 sps:$4 sm:$0xff]  }
 0x2ac   :  { %1913 = vmatpush1.bf16.msra.mxu1 %v2699_v13  ;;  %v2779_v13 = vld [vmem:[%s3794_s7 + $0x350] ss:$28 sps:$4 sm:$0xff]  }
 0x2ad   :  { %1914 = vmatprep.subr.bf16.mxu1 %v2706_v14  ;;  %v2784_v14 = vld [vmem:[%s3794_s7 + $0x14] ss:$28 sps:$4 sm:$0xff]  }
 0x2b0   :  { %1915 = vmatpush1.bf16.msra.mxu1 %v2704_v15  ;;  %v2782_v15 = vld [vmem:[%s3794_s7 + $0x10] ss:$28 sps:$4 sm:$0xff]  }
 0x2b1   :  { %1916 = vmatprep.subr.bf16.mxu1 %v2711_v16  ;;  %v2787_v16 = vld [vmem:[%s3794_s7 + $0x4c] ss:$28 sps:$4 sm:$0xff]  }
 0x2b4   :  { %1917 = vmatpush1.bf16.msra.mxu1 %v2709_v17  ;;  %v2785_v17 = vld [vmem:[%s3794_s7 + $0x48] ss:$28 sps:$4 sm:$0xff]  }
 0x2b5   :  { %1918 = vmatprep.subr.bf16.mxu1 %v2716_v18  ;;  %v2790_v18 = vld [vmem:[%s3794_s7 + $0x84] ss:$28 sps:$4 sm:$0xff]  }
 0x2b8   :  { %1919 = vmatpush1.bf16.msra.mxu1 %v2714_v19  ;;  %v2788_v19 = vld [vmem:[%s3794_s7 + $0x80] ss:$28 sps:$4 sm:$0xff]  }
 0x2b9   :  { %1920 = vmatprep.subr.bf16.mxu1 %v2721_v20  ;;  %v2793_v20 = vld [vmem:[%s3794_s7 + $0xbc] ss:$28 sps:$4 sm:$0xff]  }
 0x2bc   :  { %1921 = vmatpush1.bf16.msra.mxu1 %v2719_v21  ;;  %v2791_v21 = vld [vmem:[%s3794_s7 + $0xb8] ss:$28 sps:$4 sm:$0xff]  }
 0x2bd   :  { %1922 = vmatprep.subr.bf16.mxu1 %v2726_v22  ;;  %v2796_v22 = vld [vmem:[%s3794_s7 + $0xf4] ss:$28 sps:$4 sm:$0xff]  }
 0x2c0   :  { %1923 = vmatpush1.bf16.msra.mxu1 %v2724_v23  ;;  %v2794_v23 = vld [vmem:[%s3794_s7 + $0xf0] ss:$28 sps:$4 sm:$0xff]  }
 0x2c1   :  { %1924 = vmatprep.subr.bf16.mxu1 %v2731_v26  ;;  %v2802_v26 = vld [vmem:[%s3794_s7 + $0x164] ss:$28 sps:$4 sm:$0xff]  }
 0x2c4   :  { %1925 = vmatpush1.bf16.msra.mxu1 %v2729_v27  ;;  %v2800_v27 = vld [vmem:[%s3794_s7 + $0x160] ss:$28 sps:$4 sm:$0xff]  }
 0x2c5   :  { %1935 = vmatprep.subr.bf16.mxu1 %v2736_v30  ;;  %v2808_v30 = vld [vmem:[%s3794_s7 + $0x1d4] ss:$28 sps:$4 sm:$0xff]  }
 0x35a   :  { %v1142_v34 = vpop.f32.mrb[4].mxu1 }
 0x35b   :  { %v1143_v35 = vadd.f32 %v1142_v34, %v1021_v32  ;;  %v1144_v36 = vpop.f32.mrb[5].mxu1  ;;  %v2811_v32 = vld [vmem:[%s3794_s7 + $0x20c] ss:$28 sps:$4 sm:$0xff]   ;;  %v2814_v34 = vld [vmem:[%s3794_s7 + $0x244] ss:$28 sps:$4 sm:$0xff]  }
 0x35c   :  { %v1145_v37 = vadd.f32 %v1144_v36, %v1025_v33  ;;  %v1146_v38 = vpop.f32.mrb[6].mxu1  ;;  %v2809_v33 = vld [vmem:[%s3794_s7 + $0x208] ss:$28 sps:$4 sm:$0xff]   ;;  %v2817_v36 = vld [vmem:[%s3794_s7 + $0x27c] ss:$28 sps:$4 sm:$0xff]  }
 0x35d   :  { %v1149_v39 = vmax.f32 %v1143_v35, 0.0  ;;  %v1147_v40 = vpop.f32.mrb[7].mxu1  ;;  %v2812_v35 = vld [vmem:[%s3794_s7 + $0x240] ss:$28 sps:$4 sm:$0xff]   ;;  %v2820_v38 = vld [vmem:[%s3794_s7 + $0x2b4] ss:$28 sps:$4 sm:$0xff]  }
 0x35e   :  { %v1150_v41 = vmax.f32 %v1145_v37, 0.0  ;;  %v2815_v37 = vld [vmem:[%s3794_s7 + $0x278] ss:$28 sps:$4 sm:$0xff]   ;;  %v2823_v40 = vld [vmem:[%s3794_s7 + $0x2ec] ss:$28 sps:$4 sm:$0xff]  }
 0x35f   :  { %v3548_v44 = vpack.c.bf16 %v1149_v39, %v1149_v39  ;;  %v2818_v39 = vld [vmem:[%s3794_s7 + $0x2b0] ss:$28 sps:$4 sm:$0xff]  }
 0x360   :  { %v3543_v42 = vpack.c.bf16 %v1150_v41, %v1150_v41  ;;  %v2821_v41 = vld [vmem:[%s3794_s7 + $0x2e8] ss:$28 sps:$4 sm:$0xff]  }
 0x362   :  { %1926 = vmatprep.mubr.bf16.mxu1 %v3543_v42  ;;  %2049 = vmatprep.mubr.bf16.mxu0 %v3543_v42 }
 0x363   :  { %1927 = vmatmul.mubr.bf16.vlgmr.msra.gmra.mrb[8].mxu1 %v3548_v44  ;;  %2050 = vmatmul.mubr.bf16.vlgmr.msra.gmra.mrb[4].mxu0 %v3548_v44 }
 0x364   :  { %1936 = vmatpush1.bf16.msra.mxu1 %v2734_v43  ;;  %1967 = vmatprep.mubr.bf16.mxu1 %v3543_v42  ;;  %v2824_v43 = vld [vmem:[%s3794_s7 + $0x320] ss:$28 sps:$4 sm:$0xff]  }
 0x365   :  { %1937 = vmatprep.subr.bf16.mxu1 %v2739_v45  ;;  %v2829_v45 = vld [vmem:[%s3794_s7 + $0x35c] ss:$28 sps:$4 sm:$0xff]  }
 0x368   :  { %1938 = vmatpush1.bf16.msra.mxu1 %v2737_v46  ;;  %v2827_v46 = vld [vmem:[%s3794_s7 + $0x358] ss:$28 sps:$4 sm:$0xff]  }
 0x369   :  { %1939 = vmatprep.subr.bf16.mxu1 %v2742_v47  ;;  %v3747_v47 = vld [vmem:[%s3795_s8] sm:$0x7f] }
 0x36c   :  { %1940 = vmatpush1.bf16.msra.mxu1 %v2740_v48  ;;  %v1309_v48 = vsub.s32 6, %v3330_v3 }
 0x36d   :  { %1941 = vmatprep.subr.bf16.mxu1 %v2745_v49  ;;  %v1286_v49 = vrot.slane %v3747_v47, %v3333_v4 }
 0x370   :  { %1942 = vmatpush1.bf16.msra.mxu1 %v2743_v50  ;;  %v1290_v50 = vrot.slane %v3747_v47, %v3339_v6 }
 0x371   :  { %1943 = vmatprep.subr.bf16.mxu1 %v2748_v51 }
 0x374   :  { %1944 = vmatpush1.bf16.msra.mxu1 %v2746_v52 }
 0x375   :  { %1945 = vmatprep.subr.bf16.mxu1 %v2751_v53  ;;  %v1310_v53 = vrot.slane %v3747_v47, %v1309_v48 }
 0x378   :  { %1946 = vmatpush1.bf16.msra.mxu1 %v2749_v54 }
 0x379   :  { %1947 = vmatprep.subr.bf16.mxu1 %v2754_v55 }
 0x37c   :  { %1948 = vmatpush1.bf16.msra.mxu1 %v2752_v56 }
 0x37d   :  { %1949 = vmatprep.subr.bf16.mxu1 %v2757_v57 }
 0x380   :  { %1950 = vmatpush1.bf16.msra.mxu1 %v2755_v58 }
 0x381   :  { %1951 = vmatprep.subr.bf16.mxu1 %v2760_v59 }
 0x384   :  { %1952 = vmatpush1.bf16.msra.mxu1 %v2758_v60 }
 0x385   :  { %1953 = vmatprep.subr.bf16.mxu1 %v2763_v61 }
 0x388   :  { %1954 = vmatpush1.bf16.msra.mxu1 %v2761_v62 }
 0x389   :  { %1955 = vmatprep.subr.bf16.mxu1 %v2766_v63 }
 0x38c   :  { %1956 = vmatpush1.bf16.msra.mxu1 %v2764_v0 }
 0x38d   :  { %1957 = vmatprep.subr.bf16.mxu1 %v2769_v1 }
 0x390   :  { %1958 = vmatpush1.bf16.msra.mxu1 %v2767_v2 }
 0x391   :  { %1959 = vmatprep.subr.bf16.mxu1 %v2772_v5 }
 0x394   :  { %1960 = vmatpush1.bf16.msra.mxu1 %v2770_v7 }
 0x395   :  { %1961 = vmatprep.subr.bf16.mxu1 %v2775_v8 }
 0x398   :  { %1962 = vmatpush1.bf16.msra.mxu1 %v2773_v9 }
 0x399   :  { %1963 = vmatprep.subr.bf16.mxu1 %v2778_v10 }
 0x39c   :  { %1964 = vmatpush1.bf16.msra.mxu1 %v2776_v11 }
 0x39d   :  { %1965 = vmatprep.subr.bf16.mxu1 %v2781_v12 }
 0x3a0   :  { %1966 = vmatpush1.bf16.msra.mxu1 %v2779_v13 }
 0x3a1   :  { %1976 = vmatprep.subr.bf16.mxu1 %v2784_v14 }
 0x3a3   :  { %1968 = vmatmul.mubr.bf16.vlgmr.msra.gmra.mrb[12].mxu1 %v3548_v44 }
 0x3a4   :  { %1977 = vmatpush1.bf16.msra.mxu1 %v2782_v15  ;;  %2008 = vmatprep.mubr.bf16.mxu1 %v3543_v42  ;;  %v2826_v42 = vld [vmem:[%s3794_s7 + $0x324] ss:$28 sps:$4 sm:$0xff]   ;;  %s2907_s7 = smov [#allocation2]  }
 0x3a5   :  { %1978 = vmatprep.subr.bf16.mxu1 %v2787_v16  ;;  %s2141_s8 = sshll.u32 %s2907_s7, 4  ;;  %s2142_s8 = int_to_ptr.vmem [resolvable:$true] %s2141_s8 }
 0x3a6   :  { %s2858_s15 = scalar_lea.vmem %s2142_s8, 64  ;;  %p2863_p1 = scmp.lt.s32.totalorder %s2142_s8, %s2142_s8 }
 0x3a7   :  { %p2859_p0 = scmp.ne.s32.totalorder %s2142_s8, %s2858_s15  ;;  %p2864_p2 = scmp.lt.s32.totalorder %s2858_s15, %s2858_s15 }
 0x3a8   :  { %1979 = vmatpush1.bf16.msra.mxu1 %v2785_v17 }
 0x3a9   :  { %1980 = vmatprep.subr.bf16.mxu1 %v2790_v18  ;;  %p2865_p3 = por %p2864_p2, %p2863_p1 }
 0x3ab   :  { %p2866_p4 = pnand %p2865_p3, %p2859_p0 }
 0x3ac   :  { %1981 = vmatpush1.bf16.msra.mxu1 %v2788_v19 }
 0x3ad   :  { %1982 = vmatprep.subr.bf16.mxu1 %v2793_v20 }
 0x3b0   :  { %1983 = vmatpush1.bf16.msra.mxu1 %v2791_v21 }
 0x3b1   :  { %1984 = vmatprep.subr.bf16.mxu1 %v2796_v22 }
 0x3b4   :  { %1985 = vmatpush1.bf16.msra.mxu1 %v2794_v23 }
 0x3b5   :  { %1986 = vmatprep.subr.bf16.mxu1 %v2799_v24 }
 0x3b8   :  { %1987 = vmatpush1.bf16.msra.mxu1 %v2797_v25 }
 0x3b9   :  { %1988 = vmatprep.subr.bf16.mxu1 %v2802_v26 }
 0x3bc   :  { %1989 = vmatpush1.bf16.msra.mxu1 %v2800_v27 }
 0x3bd   :  { %1990 = vmatprep.subr.bf16.mxu1 %v2805_v28 }
 0x3c0   :  { %1991 = vmatpush1.bf16.msra.mxu1 %v2803_v29 }
 0x3c1   :  { %1992 = vmatprep.subr.bf16.mxu1 %v2808_v30 }
 0x3c4   :  { %1993 = vmatpush1.bf16.msra.mxu1 %v2806_v31 }
 0x3c5   :  { %1994 = vmatprep.subr.bf16.mxu1 %v2811_v32 }
 0x3c8   :  { %1995 = vmatpush1.bf16.msra.mxu1 %v2809_v33 }
 0x3c9   :  { %1996 = vmatprep.subr.bf16.mxu1 %v2814_v34 }
 0x3cc   :  { %1997 = vmatpush1.bf16.msra.mxu1 %v2812_v35 }
 0x3cd   :  { %1998 = vmatprep.subr.bf16.mxu1 %v2817_v36 }
 0x3d0   :  { %1999 = vmatpush1.bf16.msra.mxu1 %v2815_v37 }
 0x3d1   :  { %2000 = vmatprep.subr.bf16.mxu1 %v2820_v38 }
 0x3d4   :  { %2001 = vmatpush1.bf16.msra.mxu1 %v2818_v39 }
 0x3d5   :  { %2002 = vmatprep.subr.bf16.mxu1 %v2823_v40 }
 0x3d8   :  { %2003 = vmatpush1.bf16.msra.mxu1 %v2821_v41 }
 0x3d9   :  { %2004 = vmatprep.subr.bf16.mxu1 %v2826_v42 }
 0x3dc   :  { %2005 = vmatpush1.bf16.msra.mxu1 %v2824_v43 }
 0x3dd   :  { %2006 = vmatprep.subr.bf16.mxu1 %v2829_v45 }
 0x3e0   :  { %2007 = vmatpush1.bf16.msra.mxu1 %v2827_v46 }
 0x3e3   :  { %2009 = vmatmul.mubr.bf16.vlgmr.msra.gmra.mrb[16].mxu1 %v3548_v44 }
 0x436   :  { %v1928_v51 = vpop.f32.mrb[8].mxu1  ;;  %v2460_v52 = vpop.f32.mrb[4].mxu0 }
 0x437   :  { %v1929_v54 = vadd.f32 %v1928_v51, %v1286_v49  ;;  %v1930_v55 = vpop.f32.mrb[9].mxu1  ;;  %v2461_v44 = vpop.f32.mrb[5].mxu0 }
 0x438   :  { %v1931_v56 = vadd.f32 %v1930_v55, %v1290_v50  ;;  %v2462_v57 = vadd.f32 %v2461_v44, %v2460_v52  ;;  %v1932_v58 = vpop.f32.mrb[10].mxu1  ;;  %v2463_v59 = vpop.f32.mrb[6].mxu0 }
 0x439   :  { %v2407_v60 = vmul.f32 -1.442695, %v1929_v54  ;;  %v1933_v61 = vpop.f32.mrb[11].mxu1  ;;  %v2464_v62 = vpop.f32.mrb[7].mxu0 }
 0x43a   :  { %v2408_v63 = vmul.f32 -1.442695, %v1931_v56  ;;  %v2052_v0 = vadd.f32 %v2462_v57, %v1310_v53 }
 0x43b   :  { %2830 = vpow2.f32 %v2407_v60 }
 0x43c   :  { %2832 = vpow2.f32 %v2408_v63  ;;  %v2413_v4 = vmul.f32 -1.442695, %v2052_v0 }
 0x43e   :  { %2834 = vpow2.f32 %v2413_v4 }
 0x445   :  { %v2831_v6 = vpop.eup %2830 }
 0x446   :  { %v2833_v1 = vpop.eup %2832  ;;  %v2078_v2 = vadd.f32 1.0, %v2831_v6 }
 0x447   :  { %v2079_v5 = vadd.f32 1.0, %v2833_v1 }
 0x448   :  { %v2835_v7 = vpop.eup %2834  ;;  %2836 = vrcp.f32 %v2078_v2 }
 0x449   :  { %2838 = vrcp.f32 %v2079_v5  ;;  %v2084_v8 = vadd.f32 1.0, %v2835_v7 }
 0x44b   :  { %2840 = vrcp.f32 %v2084_v8 }
 0x44c   :  { %2869 = shalt.err (!%p2866_p4)
}
 0x44d   :  { %s2870_s17 = scalar_lea.hbm %s3796_s9, 64 }
 0x44e   :  { %p2871_p5 = scmp.ne.s32.totalorder %s3796_s9, %s2870_s17  ;;  %p2874_p6 = scmp.lt.u32.totalorder %s2870_s17, %s3796_s9 }
 0x450   :  { %p2876_p7 = pnand %p2874_p6, %p2871_p5 }
 0x452   :  { %2879 = shalt.err (!%p2876_p7)
}
 0x453   :  { %2144 = dma.vmem_to_hbm [thread:$0]  %s2142_s8, 64, %s3796_s9, [#allocation3]   ;;  %v2837_v9 = vpop.eup %2836  ;;  %vm2133_vm2 = vcmask 125952   ;;  %v1293_v14 = vsub.s32 2, %v3330_v3  ;;  %v1297_v15 = vsub.s32 3, %v3330_v3  ;;  %v1301_v33 = vsub.s32 4, %v3330_v3 }
 0x454   :  { %v2839_v10 = vpop.eup %2838  ;;  %v1305_v34 = vsub.s32 5, %v3330_v3  ;;  %s2908_s9 = smov [#allocation4]  }
 0x455   :  { %v2418_v11 = vpack.c.bf16 %v2839_v10, %v2837_v9  ;;  %v2841_v12 = vpop.eup %2840  ;;  %v1294_v16 = vrot.slane %v3747_v47, %v1293_v14  ;;  %v1298_v17 = vrot.slane %v3747_v47, %v1297_v15  ;;  %v1302_v35 = vrot.slane %v3747_v47, %v1301_v33  ;;  %s2151_s22 = sshll.u32 %s2908_s9, 4  ;;  %s2152_s22 = int_to_ptr.vmem [resolvable:$true] %s2151_s22 }
 0x456   :  { %v2421_v13 = vpack.c.bf16 %v2841_v12, %v2841_v12  ;;  %v1306_v36 = vrot.slane %v3747_v47, %v1305_v34  ;;  %s2880_s23 = scalar_lea.vmem %s2152_s22, 448  ;;  %p2885_p9 = scmp.lt.s32.totalorder %s2152_s22, %s2152_s22 }
 0x457   :  { %2130 = vst [vmem:[#allocation4] sm:$0xff] %v2418_v11  ;;  %p2881_p8 = scmp.ne.s32.totalorder %s2152_s22, %s2880_s23  ;;  %p2886_p10 = scmp.lt.s32.totalorder %s2880_s23, %s2880_s23 }
 0x458   :  { %2134 = vst.msk [vmem:[#allocation4 + $0x18] sm:$0xf] %vm2133_vm2, %v2421_v13 }
 0x459   :  { %p2887_p11 = por %p2886_p10, %p2885_p9 }
 0x45b   :  { %p2888_p12 = pnand %p2887_p11, %p2881_p8 }
 0x476   :  { %v1969_v18 = vpop.f32.mrb[12].mxu1 }
 0x477   :  { %v1970_v19 = vadd.f32 %v1969_v18, %v1294_v16  ;;  %v1971_v20 = vpop.f32.mrb[13].mxu1 }
 0x478   :  { %v1972_v21 = vadd.f32 %v1971_v20, %v1298_v17  ;;  %v1973_v22 = vpop.f32.mrb[14].mxu1 }
 0x479   :  { %v2409_v23 = vmul.f32 -1.442695, %v1970_v19  ;;  %v1974_v24 = vpop.f32.mrb[15].mxu1 }
 0x47a   :  { %v2410_v25 = vmul.f32 -1.442695, %v1972_v21 }
 0x47b   :  { %2842 = vpow2.f32 %v2409_v23 }
 0x47c   :  { %2844 = vpow2.f32 %v2410_v25 }
 0x485   :  { %v2843_v26 = vpop.eup %2842 }
 0x486   :  { %v2845_v27 = vpop.eup %2844  ;;  %v2080_v28 = vadd.f32 1.0, %v2843_v26 }
 0x487   :  { %v2081_v29 = vadd.f32 1.0, %v2845_v27 }
 0x488   :  { %2846 = vrcp.f32 %v2080_v28 }
 0x489   :  { %2848 = vrcp.f32 %v2081_v29 }
 0x492   :  { %v2847_v30 = vpop.eup %2846 }
 0x493   :  { %v2849_v31 = vpop.eup %2848 }
 0x494   :  { %v2419_v32 = vpack.c.bf16 %v2849_v31, %v2847_v30 }
 0x496   :  { %2131 = vst [vmem:[#allocation4 + $0x8] sm:$0xff] %v2419_v32 }
 0x4b6   :  { %v2010_v37 = vpop.f32.mrb[16].mxu1 }
 0x4b7   :  { %v2011_v38 = vadd.f32 %v2010_v37, %v1302_v35  ;;  %v2012_v39 = vpop.f32.mrb[17].mxu1 }
 0x4b8   :  { %v2013_v40 = vadd.f32 %v2012_v39, %v1306_v36  ;;  %v2014_v41 = vpop.f32.mrb[18].mxu1 }
 0x4b9   :  { %v2411_v42 = vmul.f32 -1.442695, %v2011_v38  ;;  %v2015_v43 = vpop.f32.mrb[19].mxu1 }
 0x4ba   :  { %v2412_v45 = vmul.f32 -1.442695, %v2013_v40 }
 0x4bb   :  { %2850 = vpow2.f32 %v2411_v42 }
 0x4bc   :  { %2852 = vpow2.f32 %v2412_v45 }
 0x4c5   :  { %v2851_v46 = vpop.eup %2850 }
 0x4c6   :  { %v2853_v48 = vpop.eup %2852  ;;  %v2082_v49 = vadd.f32 1.0, %v2851_v46 }
 0x4c7   :  { %v2083_v50 = vadd.f32 1.0, %v2853_v48 }
 0x4c8   :  { %2854 = vrcp.f32 %v2082_v49 }
 0x4c9   :  { %2856 = vrcp.f32 %v2083_v50 }
 0x4d2   :  { %v2855_v3 = vpop.eup %2854 }
 0x4d3   :  { %v2857_v47 = vpop.eup %2856 }
 0x4d4   :  { %v2420_v51 = vpack.c.bf16 %v2857_v47, %v2855_v3 }
 0x4d6   :  { %2132 = vst [vmem:[#allocation4 + $0x10] sm:$0xff] %v2420_v51 }
 0x4d7   :  { %2891 = shalt.err (!%p2888_p12)
}
 0x4d8   :  { %s2892_s26 = scalar_lea.hbm %s3797_s10, 448 }
 0x4d9   :  { %p2893_p13 = scmp.ne.s32.totalorder %s3797_s10, %s2892_s26  ;;  %p2896_p0 = scmp.lt.u32.totalorder %s2892_s26, %s3797_s10 }
 0x4db   :  { %p2898_p1 = pnand %p2896_p0, %p2893_p13 }
 0x4dd   :  { %2901 = shalt.err (!%p2898_p1)
}
 0x4de   :  { %2154 = dma.vmem_to_hbm [thread:$0]  %s2152_s22, 448, %s3797_s10, [#allocation5]  }
 0x4df   :  { %2902 = dma.done.wait [#allocation3], 64  }
 0x4e0   :  { %2903 = vsyncadd [#allocation3], 4294967232 }
 0x4e1   :  { %2904 = dma.done.wait [#allocation5], 448  }
 0x4e2   :  { %2905 = vsyncadd [#allocation5], 4294966848 }
 0x4e3   :  { %2161 = vsyncpa [#allocation3], 1 }
 0x4e4   :  { %2162 = vsyncpa [#allocation5], 1 }

</bundles_post_ra>
